<compile_context>
chip_gen: v6e
topology: v6e:2x2x1
jax: 0.10.0
libtpu: 0.0.40
codegen_flags: <defaults>
</compile_context>

<pallas_src>
import functools
import math

import jax
import jax.numpy as jnp
from jax.experimental import pallas as pl
from jax.experimental.pallas import tpu as pltpu

_EPS = 1e-5
_LANE = 128


def _round_up(n, m):
    return (n + m - 1) // m * m


def _fused_deep_projection_kernel(num_layers, out_features, x_ref, w_ref, aux_ref, o_ref):
    """All `num_layers` stages of BatchNorm1d(batch stats) -> Linear fused in one body.

    x_ref:   (B, Dp)        activations (feature dim zero-padded to Dp lanes)
    w_ref:   (L, Dp, Dp)    zero-padded weights, layer l at w_ref[l]
    aux_ref: (L, 8, Dp)     row 0 = gamma (0 in padded lanes), row 1 = beta, row 2 = bias
    o_ref:   (B, out_features)
    """
    x = x_ref[...]
    if x.dtype != jnp.float32:          # static (trace-time) branch; no-op for f32 inputs
        x = x.astype(jnp.float32)
    inv_b = 1.0 / x.shape[0]
    last = num_layers - 1

    for l in range(num_layers):         # static unroll (5 layers)
        aux = aux_ref[l]                # (8, Dp): one small VMEM load per layer
        gamma = aux[0:1, :]

        # One-pass training-mode BN statistics: the two cross-sublane (XLU) reductions are
        # independent, so they are not serialized through a mean broadcast.
        s = jnp.sum(x, axis=0, keepdims=True)            # (1, Dp)
        ss = jnp.sum(x * x, axis=0, keepdims=True)       # (1, Dp)
        mean = s * inv_b
        var = ss * inv_b - mean * mean                   # biased variance (BN training mode)
        scale = gamma * jax.lax.rsqrt(var + _EPS)        # padded lanes: gamma==0 -> exactly 0

        xn = (x - mean) * scale                          # fused normalize + affine scale
        if l == last:
            # beta / bias of layers 0..L-2 are per-feature constants that the next BN's
            # batch-mean subtraction cancels exactly; only the last layer's survive.
            xn = xn + aux[1:2, :]                        # beta

        # activation = None (module default) -> no-op.
        # Dropout evaluated in inference mode -> identity.
        x = jnp.dot(xn, w_ref[l], preferred_element_type=jnp.float32)
        if l == last:
            x = x + aux[2:3, :]                          # bias

    # Single final store; only the valid output lanes are written.
    o_ref[...] = x[:, :out_features].astype(o_ref.dtype)


@functools.partial(jax.jit, static_argnames=("out_features",))
def deep_projection_pallas(x, w_packed, aux_packed, out_features):
    num_layers, d_pad, _ = w_packed.shape
    B = x.shape[0]

    if x.shape[1] < d_pad:              # static shape check; no-op at the test size
        x = jnp.pad(x, ((0, 0), (0, d_pad - x.shape[1])))

    vmem = pl.BlockSpec(memory_space=pltpu.MemorySpace.VMEM)

    # Advisory cost estimate: padded matmul flops + ~8 VPU ops/element for BN, rsqrt/feature.
    flops = num_layers * (2 * B * d_pad * d_pad + 8 * B * d_pad)
    transcendentals = num_layers * d_pad
    bytes_accessed = (x.size + w_packed.size + aux_packed.size + B * out_features) * 4

    return pl.pallas_call(
        functools.partial(_fused_deep_projection_kernel, num_layers, out_features),
        out_shape=jax.ShapeDtypeStruct((B, out_features), jnp.float32),
        in_specs=[vmem, vmem, vmem],
        out_specs=vmem,
        cost_estimate=pl.CostEstimate(
            flops=flops,
            transcendentals=transcendentals,
            bytes_accessed=bytes_accessed,
        ),
    )(x, w_packed, aux_packed)


def init_deep_projection_params(key, in_features, out_features, num_layers=5):
    """Deterministic parameter init mirroring the PyTorch module's shapes.

    Linear weights are stored pre-transposed as (F_in, F_out) so the kernel does x @ W.
    gamma/beta are perturbed away from the (1, 0) PyTorch defaults so the beta/bias-dropping
    and padded-gamma logic in the kernel is actually exercised by the correctness check.
    """
    proj_inputs = [int(in_features // 2 ** i) for i in range(num_layers)]
    proj_outputs = proj_inputs[1:] + [out_features]
    params = []
    for din, dout in zip(proj_inputs, proj_outputs):
        key, kw, kb, kg, kbe = jax.random.split(key, 5)
        bound = 1.0 / math.sqrt(din)
        w = jax.random.uniform(kw, (din, dout), jnp.float32, -bound, bound)
        b = jax.random.uniform(kb, (1, dout), jnp.float32, -bound, bound)
        gamma = 1.0 + 0.1 * jax.random.normal(kg, (1, din), jnp.float32)
        beta = 0.1 * jax.random.normal(kbe, (1, din), jnp.float32)
        params.append(dict(gamma=gamma, beta=beta, w=w, b=b))
    return params


def pack_params(params, lane=_LANE):
    """Pack all layers into two zero-padded, lane-dense slabs.

    w_packed[l, :din, :dout]  = W_l          (zeros elsewhere)
    aux_packed[l, 0, :din]    = gamma_l      (padded gamma lanes stay exactly 0)
    aux_packed[l, 1, :din]    = beta_l
    aux_packed[l, 2, :dout]   = bias_l
    """
    num_layers = len(params)
    d_pad = max(_round_up(max(max(p["w"].shape) for p in params), lane), lane)
    w_packed = jnp.zeros((num_layers, d_pad, d_pad), jnp.float32)
    aux_packed = jnp.zeros((num_layers, 8, d_pad), jnp.float32)
    for l, p in enumerate(params):
        din, dout = p["w"].shape
        w_packed = w_packed.at[l, :din, :dout].set(p["w"])
        aux_packed = aux_packed.at[l, 0, :din].set(p["gamma"][0])
        aux_packed = aux_packed.at[l, 1, :din].set(p["beta"][0])
        aux_packed = aux_packed.at[l, 2, :dout].set(p["b"][0])
    return w_packed, aux_packed


def deep_projection_ref(x, params):
    """Pure-JAX reference (full semantics: two-pass variance, all betas/biases kept)."""
    data = x.astype(jnp.float32)
    for p in params:
        mean = jnp.mean(data, axis=0, keepdims=True)
        var = jnp.mean((data - mean) ** 2, axis=0, keepdims=True)
        data = (data - mean) * jax.lax.rsqrt(var + _EPS) * p["gamma"] + p["beta"]
        data = data @ p["w"] + p["b"]
    return data


if __name__ == "__main__":
    B, IN_F, OUT_F, NUM_LAYERS = 8, 128, 32, 5

    key = jax.random.PRNGKey(0)
    kx, kp = jax.random.split(key)
    x = jax.random.normal(kx, (B, IN_F), jnp.float32)
    params = init_deep_projection_params(kp, IN_F, OUT_F, NUM_LAYERS)
    w_packed, aux_packed = pack_params(params)

    out = deep_projection_pallas(x, w_packed, aux_packed, OUT_F)
    out = jax.block_until_ready(out)

    ref = deep_projection_ref(x, params)
    assert out.shape == (B, OUT_F), out.shape
    max_err = float(jnp.max(jnp.abs(out - ref)))
    assert jnp.allclose(out, ref, atol=1e-4, rtol=1e-4), max_err

    print("KERNEL_OK")
</pallas_src>

<mosaic_0001>
module attributes {stable_mosaic.version = 11 : i64} {
  func.func @_fused_deep_projection_kernel(%arg0: memref<8x128xf32, #tpu.memory_space<vmem>>, %arg1: memref<5x128x128xf32, #tpu.memory_space<vmem>>, %arg2: memref<5x8x128xf32, #tpu.memory_space<vmem>>, %arg3: memref<8x32xf32, #tpu.memory_space<vmem>>) attributes {dimension_semantics = [], scalar_prefetch = 0 : i64, scratch_operands = 0 : i64, tpu.core_type = #tpu.core_type<tc>} {
    %c0 = arith.constant 0 : index
    %c0_0 = arith.constant 0 : index
    %0 = vector.load %arg0[%c0, %c0_0] : memref<8x128xf32, #tpu.memory_space<vmem>>, vector<8x128xf32>
    %c0_1 = arith.constant 0 : index
    %c0_2 = arith.constant 0 : index
    %c0_3 = arith.constant 0 : index
    %1 = vector.load %arg2[%c0_1, %c0_2, %c0_3] : memref<5x8x128xf32, #tpu.memory_space<vmem>>, vector<1x8x128xf32>
    %2 = vector.shape_cast %1 : vector<1x8x128xf32> to vector<8x128xf32>
    %3 = vector.extract_strided_slice %2 {offsets = [0, 0], sizes = [1, 128], strides = [1, 1]} : vector<8x128xf32> to vector<1x128xf32>
    %cst = arith.constant dense<0.000000e+00> : vector<128xf32>
    %4 = vector.multi_reduction <add>, %0, %cst [0] : vector<8x128xf32> to vector<128xf32>
    %5 = vector.shape_cast %4 : vector<128xf32> to vector<1x128xf32>
    %6 = arith.mulf %0, %0 : vector<8x128xf32>
    %cst_4 = arith.constant dense<0.000000e+00> : vector<128xf32>
    %7 = vector.multi_reduction <add>, %6, %cst_4 [0] : vector<8x128xf32> to vector<128xf32>
    %8 = vector.shape_cast %7 : vector<128xf32> to vector<1x128xf32>
    %cst_5 = arith.constant 1.250000e-01 : f32
    %9 = vector.broadcast %cst_5 : f32 to vector<1x128xf32>
    %10 = arith.mulf %5, %9 : vector<1x128xf32>
    %cst_6 = arith.constant 1.250000e-01 : f32
    %11 = vector.broadcast %cst_6 : f32 to vector<1x128xf32>
    %12 = arith.mulf %8, %11 : vector<1x128xf32>
    %13 = arith.mulf %10, %10 : vector<1x128xf32>
    %14 = arith.subf %12, %13 : vector<1x128xf32>
    %cst_7 = arith.constant 9.99999974E-6 : f32
    %15 = vector.broadcast %cst_7 : f32 to vector<1x128xf32>
    %16 = arith.addf %14, %15 : vector<1x128xf32>
    %17 = math.rsqrt %16 : vector<1x128xf32>
    %18 = arith.mulf %3, %17 : vector<1x128xf32>
    %19 = vector.broadcast %10 : vector<1x128xf32> to vector<8x128xf32>
    %20 = arith.subf %0, %19 : vector<8x128xf32>
    %21 = vector.broadcast %18 : vector<1x128xf32> to vector<8x128xf32>
    %22 = arith.mulf %20, %21 : vector<8x128xf32>
    %c0_8 = arith.constant 0 : index
    %c0_9 = arith.constant 0 : index
    %c0_10 = arith.constant 0 : index
    %23 = vector.load %arg1[%c0_8, %c0_9, %c0_10] : memref<5x128x128xf32, #tpu.memory_space<vmem>>, vector<1x128x128xf32>
    %24 = vector.shape_cast %23 : vector<1x128x128xf32> to vector<128x128xf32>
    %cst_11 = arith.constant dense<0.000000e+00> : vector<8x128xf32>
    %25 = tpu.matmul %22, %24, %cst_11 {dimension_numbers = #tpu.dot_dimension_numbers<[1], [0], [0], [1], [0, 0, 1, 1], [], []>} : vector<8x128xf32>, vector<128x128xf32>, vector<8x128xf32> -> vector<8x128xf32>
    %c1 = arith.constant 1 : index
    %c0_12 = arith.constant 0 : index
    %c0_13 = arith.constant 0 : index
    %26 = vector.load %arg2[%c1, %c0_12, %c0_13] : memref<5x8x128xf32, #tpu.memory_space<vmem>>, vector<1x8x128xf32>
    %27 = vector.shape_cast %26 : vector<1x8x128xf32> to vector<8x128xf32>
    %28 = vector.extract_strided_slice %27 {offsets = [0, 0], sizes = [1, 128], strides = [1, 1]} : vector<8x128xf32> to vector<1x128xf32>
    %cst_14 = arith.constant dense<0.000000e+00> : vector<128xf32>
    %29 = vector.multi_reduction <add>, %25, %cst_14 [0] : vector<8x128xf32> to vector<128xf32>
    %30 = vector.shape_cast %29 : vector<128xf32> to vector<1x128xf32>
    %31 = arith.mulf %25, %25 : vector<8x128xf32>
    %cst_15 = arith.constant dense<0.000000e+00> : vector<128xf32>
    %32 = vector.multi_reduction <add>, %31, %cst_15 [0] : vector<8x128xf32> to vector<128xf32>
    %33 = vector.shape_cast %32 : vector<128xf32> to vector<1x128xf32>
    %cst_16 = arith.constant 1.250000e-01 : f32
    %34 = vector.broadcast %cst_16 : f32 to vector<1x128xf32>
    %35 = arith.mulf %30, %34 : vector<1x128xf32>
    %cst_17 = arith.constant 1.250000e-01 : f32
    %36 = vector.broadcast %cst_17 : f32 to vector<1x128xf32>
    %37 = arith.mulf %33, %36 : vector<1x128xf32>
    %38 = arith.mulf %35, %35 : vector<1x128xf32>
    %39 = arith.subf %37, %38 : vector<1x128xf32>
    %cst_18 = arith.constant 9.99999974E-6 : f32
    %40 = vector.broadcast %cst_18 : f32 to vector<1x128xf32>
    %41 = arith.addf %39, %40 : vector<1x128xf32>
    %42 = math.rsqrt %41 : vector<1x128xf32>
    %43 = arith.mulf %28, %42 : vector<1x128xf32>
    %44 = vector.broadcast %35 : vector<1x128xf32> to vector<8x128xf32>
    %45 = arith.subf %25, %44 : vector<8x128xf32>
    %46 = vector.broadcast %43 : vector<1x128xf32> to vector<8x128xf32>
    %47 = arith.mulf %45, %46 : vector<8x128xf32>
    %c1_19 = arith.constant 1 : index
    %c0_20 = arith.constant 0 : index
    %c0_21 = arith.constant 0 : index
    %48 = vector.load %arg1[%c1_19, %c0_20, %c0_21] : memref<5x128x128xf32, #tpu.memory_space<vmem>>, vector<1x128x128xf32>
    %49 = vector.shape_cast %48 : vector<1x128x128xf32> to vector<128x128xf32>
    %cst_22 = arith.constant dense<0.000000e+00> : vector<8x128xf32>
    %50 = tpu.matmul %47, %49, %cst_22 {dimension_numbers = #tpu.dot_dimension_numbers<[1], [0], [0], [1], [0, 0, 1, 1], [], []>} : vector<8x128xf32>, vector<128x128xf32>, vector<8x128xf32> -> vector<8x128xf32>
    %c2 = arith.constant 2 : index
    %c0_23 = arith.constant 0 : index
    %c0_24 = arith.constant 0 : index
    %51 = vector.load %arg2[%c2, %c0_23, %c0_24] : memref<5x8x128xf32, #tpu.memory_space<vmem>>, vector<1x8x128xf32>
    %52 = vector.shape_cast %51 : vector<1x8x128xf32> to vector<8x128xf32>
    %53 = vector.extract_strided_slice %52 {offsets = [0, 0], sizes = [1, 128], strides = [1, 1]} : vector<8x128xf32> to vector<1x128xf32>
    %cst_25 = arith.constant dense<0.000000e+00> : vector<128xf32>
    %54 = vector.multi_reduction <add>, %50, %cst_25 [0] : vector<8x128xf32> to vector<128xf32>
    %55 = vector.shape_cast %54 : vector<128xf32> to vector<1x128xf32>
    %56 = arith.mulf %50, %50 : vector<8x128xf32>
    %cst_26 = arith.constant dense<0.000000e+00> : vector<128xf32>
    %57 = vector.multi_reduction <add>, %56, %cst_26 [0] : vector<8x128xf32> to vector<128xf32>
    %58 = vector.shape_cast %57 : vector<128xf32> to vector<1x128xf32>
    %cst_27 = arith.constant 1.250000e-01 : f32
    %59 = vector.broadcast %cst_27 : f32 to vector<1x128xf32>
    %60 = arith.mulf %55, %59 : vector<1x128xf32>
    %cst_28 = arith.constant 1.250000e-01 : f32
    %61 = vector.broadcast %cst_28 : f32 to vector<1x128xf32>
    %62 = arith.mulf %58, %61 : vector<1x128xf32>
    %63 = arith.mulf %60, %60 : vector<1x128xf32>
    %64 = arith.subf %62, %63 : vector<1x128xf32>
    %cst_29 = arith.constant 9.99999974E-6 : f32
    %65 = vector.broadcast %cst_29 : f32 to vector<1x128xf32>
    %66 = arith.addf %64, %65 : vector<1x128xf32>
    %67 = math.rsqrt %66 : vector<1x128xf32>
    %68 = arith.mulf %53, %67 : vector<1x128xf32>
    %69 = vector.broadcast %60 : vector<1x128xf32> to vector<8x128xf32>
    %70 = arith.subf %50, %69 : vector<8x128xf32>
    %71 = vector.broadcast %68 : vector<1x128xf32> to vector<8x128xf32>
    %72 = arith.mulf %70, %71 : vector<8x128xf32>
    %c2_30 = arith.constant 2 : index
    %c0_31 = arith.constant 0 : index
    %c0_32 = arith.constant 0 : index
    %73 = vector.load %arg1[%c2_30, %c0_31, %c0_32] : memref<5x128x128xf32, #tpu.memory_space<vmem>>, vector<1x128x128xf32>
    %74 = vector.shape_cast %73 : vector<1x128x128xf32> to vector<128x128xf32>
    %cst_33 = arith.constant dense<0.000000e+00> : vector<8x128xf32>
    %75 = tpu.matmul %72, %74, %cst_33 {dimension_numbers = #tpu.dot_dimension_numbers<[1], [0], [0], [1], [0, 0, 1, 1], [], []>} : vector<8x128xf32>, vector<128x128xf32>, vector<8x128xf32> -> vector<8x128xf32>
    %c3 = arith.constant 3 : index
    %c0_34 = arith.constant 0 : index
    %c0_35 = arith.constant 0 : index
    %76 = vector.load %arg2[%c3, %c0_34, %c0_35] : memref<5x8x128xf32, #tpu.memory_space<vmem>>, vector<1x8x128xf32>
    %77 = vector.shape_cast %76 : vector<1x8x128xf32> to vector<8x128xf32>
    %78 = vector.extract_strided_slice %77 {offsets = [0, 0], sizes = [1, 128], strides = [1, 1]} : vector<8x128xf32> to vector<1x128xf32>
    %cst_36 = arith.constant dense<0.000000e+00> : vector<128xf32>
    %79 = vector.multi_reduction <add>, %75, %cst_36 [0] : vector<8x128xf32> to vector<128xf32>
    %80 = vector.shape_cast %79 : vector<128xf32> to vector<1x128xf32>
    %81 = arith.mulf %75, %75 : vector<8x128xf32>
    %cst_37 = arith.constant dense<0.000000e+00> : vector<128xf32>
    %82 = vector.multi_reduction <add>, %81, %cst_37 [0] : vector<8x128xf32> to vector<128xf32>
    %83 = vector.shape_cast %82 : vector<128xf32> to vector<1x128xf32>
    %cst_38 = arith.constant 1.250000e-01 : f32
    %84 = vector.broadcast %cst_38 : f32 to vector<1x128xf32>
    %85 = arith.mulf %80, %84 : vector<1x128xf32>
    %cst_39 = arith.constant 1.250000e-01 : f32
    %86 = vector.broadcast %cst_39 : f32 to vector<1x128xf32>
    %87 = arith.mulf %83, %86 : vector<1x128xf32>
    %88 = arith.mulf %85, %85 : vector<1x128xf32>
    %89 = arith.subf %87, %88 : vector<1x128xf32>
    %cst_40 = arith.constant 9.99999974E-6 : f32
    %90 = vector.broadcast %cst_40 : f32 to vector<1x128xf32>
    %91 = arith.addf %89, %90 : vector<1x128xf32>
    %92 = math.rsqrt %91 : vector<1x128xf32>
    %93 = arith.mulf %78, %92 : vector<1x128xf32>
    %94 = vector.broadcast %85 : vector<1x128xf32> to vector<8x128xf32>
    %95 = arith.subf %75, %94 : vector<8x128xf32>
    %96 = vector.broadcast %93 : vector<1x128xf32> to vector<8x128xf32>
    %97 = arith.mulf %95, %96 : vector<8x128xf32>
    %c3_41 = arith.constant 3 : index
    %c0_42 = arith.constant 0 : index
    %c0_43 = arith.constant 0 : index
    %98 = vector.load %arg1[%c3_41, %c0_42, %c0_43] : memref<5x128x128xf32, #tpu.memory_space<vmem>>, vector<1x128x128xf32>
    %99 = vector.shape_cast %98 : vector<1x128x128xf32> to vector<128x128xf32>
    %cst_44 = arith.constant dense<0.000000e+00> : vector<8x128xf32>
    %100 = tpu.matmul %97, %99, %cst_44 {dimension_numbers = #tpu.dot_dimension_numbers<[1], [0], [0], [1], [0, 0, 1, 1], [], []>} : vector<8x128xf32>, vector<128x128xf32>, vector<8x128xf32> -> vector<8x128xf32>
    %c4 = arith.constant 4 : index
    %c0_45 = arith.constant 0 : index
    %c0_46 = arith.constant 0 : index
    %101 = vector.load %arg2[%c4, %c0_45, %c0_46] : memref<5x8x128xf32, #tpu.memory_space<vmem>>, vector<1x8x128xf32>
    %102 = vector.shape_cast %101 : vector<1x8x128xf32> to vector<8x128xf32>
    %103 = vector.extract_strided_slice %102 {offsets = [0, 0], sizes = [1, 128], strides = [1, 1]} : vector<8x128xf32> to vector<1x128xf32>
    %cst_47 = arith.constant dense<0.000000e+00> : vector<128xf32>
    %104 = vector.multi_reduction <add>, %100, %cst_47 [0] : vector<8x128xf32> to vector<128xf32>
    %105 = vector.shape_cast %104 : vector<128xf32> to vector<1x128xf32>
    %106 = arith.mulf %100, %100 : vector<8x128xf32>
    %cst_48 = arith.constant dense<0.000000e+00> : vector<128xf32>
    %107 = vector.multi_reduction <add>, %106, %cst_48 [0] : vector<8x128xf32> to vector<128xf32>
    %108 = vector.shape_cast %107 : vector<128xf32> to vector<1x128xf32>
    %cst_49 = arith.constant 1.250000e-01 : f32
    %109 = vector.broadcast %cst_49 : f32 to vector<1x128xf32>
    %110 = arith.mulf %105, %109 : vector<1x128xf32>
    %cst_50 = arith.constant 1.250000e-01 : f32
    %111 = vector.broadcast %cst_50 : f32 to vector<1x128xf32>
    %112 = arith.mulf %108, %111 : vector<1x128xf32>
    %113 = arith.mulf %110, %110 : vector<1x128xf32>
    %114 = arith.subf %112, %113 : vector<1x128xf32>
    %cst_51 = arith.constant 9.99999974E-6 : f32
    %115 = vector.broadcast %cst_51 : f32 to vector<1x128xf32>
    %116 = arith.addf %114, %115 : vector<1x128xf32>
    %117 = math.rsqrt %116 : vector<1x128xf32>
    %118 = arith.mulf %103, %117 : vector<1x128xf32>
    %119 = vector.broadcast %110 : vector<1x128xf32> to vector<8x128xf32>
    %120 = arith.subf %100, %119 : vector<8x128xf32>
    %121 = vector.broadcast %118 : vector<1x128xf32> to vector<8x128xf32>
    %122 = arith.mulf %120, %121 : vector<8x128xf32>
    %123 = vector.extract_strided_slice %102 {offsets = [1, 0], sizes = [1, 128], strides = [1, 1]} : vector<8x128xf32> to vector<1x128xf32>
    %124 = vector.broadcast %123 : vector<1x128xf32> to vector<8x128xf32>
    %125 = arith.addf %122, %124 : vector<8x128xf32>
    %c4_52 = arith.constant 4 : index
    %c0_53 = arith.constant 0 : index
    %c0_54 = arith.constant 0 : index
    %126 = vector.load %arg1[%c4_52, %c0_53, %c0_54] : memref<5x128x128xf32, #tpu.memory_space<vmem>>, vector<1x128x128xf32>
    %127 = vector.shape_cast %126 : vector<1x128x128xf32> to vector<128x128xf32>
    %cst_55 = arith.constant dense<0.000000e+00> : vector<8x128xf32>
    %128 = tpu.matmul %125, %127, %cst_55 {dimension_numbers = #tpu.dot_dimension_numbers<[1], [0], [0], [1], [0, 0, 1, 1], [], []>} : vector<8x128xf32>, vector<128x128xf32>, vector<8x128xf32> -> vector<8x128xf32>
    %129 = vector.extract_strided_slice %102 {offsets = [2, 0], sizes = [1, 128], strides = [1, 1]} : vector<8x128xf32> to vector<1x128xf32>
    %130 = vector.broadcast %129 : vector<1x128xf32> to vector<8x128xf32>
    %131 = arith.addf %128, %130 : vector<8x128xf32>
    %132 = vector.extract_strided_slice %131 {offsets = [0, 0], sizes = [8, 32], strides = [1, 1]} : vector<8x128xf32> to vector<8x32xf32>
    %c0_56 = arith.constant 0 : index
    %c0_57 = arith.constant 0 : index
    %133 = vector.load %arg3[%c0_56, %c0_57] : memref<8x32xf32, #tpu.memory_space<vmem>>, vector<8x32xf32>
    tpu.vector_store %arg3[%c0_56, %c0_57], %132 {strides = array<i32>} : memref<8x32xf32, #tpu.memory_space<vmem>>, vector<8x32xf32>,
    return
  }
}

</mosaic_0001>

<bundles_post_ra>
// kernel: deep_projection_pallas.1
= control target key start
LH: loop header
LB: loop body
LE: loop exit
PB: predicated region body
PF: predicated region fallthrough
CT: control target
= control target key end

     0   :  { %8 = vsyncpa [#allocation3], 0  ;;  %s1168_s0 = inlined_call_operand.hbm [shape: f32[8,128], index: 0, kind: input, shape index: {}]   ;;  %s1169_s1 = inlined_call_operand.hbm [shape: f32[5,128,128], index: 1, kind: input, shape index: {}]   ;;  %s1170_s2 = inlined_call_operand.hbm [shape: f32[5,8,128], index: 2, kind: input, shape index: {}]   ;;  %s1171_s3 = inlined_call_operand.hbm [shape: f32[8,32], index: 3, kind: output, shape index: {}]  }
   0x1   :  { %9 = vsyncpa [#allocation6], 0 }
   0x2   :  { %10 = vsyncpa [#allocation4], 0  ;;  %s1019_s12 = smov [#allocation5]  }
   0x3   :  { %s26_s13 = sshll.u32 %s1019_s12, 4  ;;  %s27_s13 = int_to_ptr.vmem [resolvable:$true] %s26_s13 }
   0x4   :  { %s941_s14 = scalar_lea.vmem %s27_s13, 10240  ;;  %p946_p1 = scmp.lt.s32.totalorder %s27_s13, %s27_s13 }
   0x5   :  { %p942_p0 = scmp.ne.s32.totalorder %s27_s13, %s941_s14  ;;  %p947_p2 = scmp.lt.s32.totalorder %s941_s14, %s941_s14 }
   0x7   :  { %p948_p3 = por %p947_p2, %p946_p1 }
   0x9   :  { %p949_p4 = pnand %p948_p3, %p942_p0 }
   0xb   :  { %952 = shalt.err (!%p949_p4)
}
   0xc   :  { %s1020_s15 = smov 128   ;;  %s1021_s16 = smov 8  }
   0xd   :  { %32 = dma.hbm_to_vmem [thread:$0]  %s1169_s1, 10240, %s27_s13, [#allocation6], %s1020_s15, %s1020_s15, %s1021_s16  }
   0xe   :  { %s1022_s19 = smov [#allocation2]   ;;  %s1023_s21 = smov [#allocation7]  }
   0xf   :  { %s17_s20 = sshll.u32 %s1022_s19, 4  ;;  %s38_s22 = sshll.u32 %s1023_s21, 4  ;;  %s18_s20 = int_to_ptr.vmem [resolvable:$true] %s17_s20  ;;  %s39_s22 = int_to_ptr.vmem [resolvable:$true] %s38_s22 }
  0x10   :  { %s961_s23 = scalar_lea.vmem %s18_s20, 128  ;;  %p966_p6 = scmp.lt.s32.totalorder %s18_s20, %s18_s20 }
  0x11   :  { %p962_p5 = scmp.ne.s32.totalorder %s18_s20, %s961_s23  ;;  %p967_p7 = scmp.lt.s32.totalorder %s961_s23, %s961_s23 }
  0x13   :  { %p968_p8 = por %p967_p7, %p966_p6 }
  0x15   :  { %p969_p9 = pnand %p968_p8, %p962_p5 }
  0x17   :  { %972 = shalt.err (!%p969_p9)
}
  0x18   :  { %20 = dma.hbm_to_vmem [thread:$0]  %s1168_s0, 128, %s18_s20, [#allocation3]  }
  0x19   :  { %s981_s26 = scalar_lea.vmem %s39_s22, 640  ;;  %p986_p11 = scmp.lt.s32.totalorder %s39_s22, %s39_s22 }
  0x1a   :  { %p982_p10 = scmp.ne.s32.totalorder %s39_s22, %s981_s26  ;;  %p987_p12 = scmp.lt.s32.totalorder %s981_s26, %s981_s26 }
  0x1c   :  { %p988_p13 = por %p987_p12, %p986_p11 }
  0x1e   :  { %p989_p0 = pnand %p988_p13, %p982_p10 }
  0x20   :  { %992 = shalt.err (!%p989_p0)
}
  0x21   :  { %44 = dma.hbm_to_vmem [thread:$0]  %s1170_s2, 640, %s39_s22, [#allocation6], %s1020_s15, %s1020_s15, %s1021_s16  }
  0x22   :  { %1013 = dma.done.wait [#allocation3], 128  }
  0x23   :  { %1014 = vsyncadd [#allocation3], 4294967168 }
  0x24   :  { %1015 = dma.done.wait [#allocation6], 10880  }
  0x25   :  { %1016 = vsyncadd [#allocation6], 4294956416  ;;  %v1024_v0 = vmov 0.0   ;;  %vm1025_vm0 = vmmov 0   ;;  %v97_v1 = vld [vmem:[#allocation5 + $0x78] sm:$0xff]  ;;  %v96_v2 = vld [vmem:[#allocation5 + $0x70] sm:$0xff]  ;;  %v77_v36 = vlaneseq }
  0x26   :  { %740 = vmatprep.subr.mxu0 %v1024_v0  ;;  %772 = vmatprep.mubr.msk.f32.mxu0 %vm1025_vm0, %v1024_v0  ;;  %v95_v3 = vld [vmem:[#allocation5 + $0x68] sm:$0xff]  ;;  %v94_v4 = vld [vmem:[#allocation5 + $0x60] sm:$0xff]  ;;  %v1064_v5 = vld [vmem:[#allocation2] sm:$0xff]  ;;  %s1026_s0 = smov [#allocation8]   ;;  %vm637_vm1 = vcmask 261120  }
  0x27   :  { %775 = vmatprep.subr.mxu1 %v1024_v0  ;;  %807 = vmatprep.mubr.msk.f32.mxu1 %vm1025_vm0, %v1024_v0  ;;  %v93_v6 = vld [vmem:[#allocation5 + $0x58] sm:$0xff]  ;;  %v56_v7 = vrot.slane %v1064_v5, 4  ;;  %v62_v8 = vmul.f32 %v1064_v5, %v1064_v5  ;;  %v92_v9 = vld [vmem:[#allocation5 + $0x50] sm:$0xff]  ;;  %v91_v12 = vld [vmem:[#allocation5 + $0x48] sm:$0xff]  ;;  %v1084_v37 = vshrl.u32 %v77_v36, 7  ;;  %s645_s2 = sshll.u32 %s1026_s0, 4  ;;  %s646_s2 = int_to_ptr.vmem [resolvable:$true] %s645_s2 }
  0x28   :  { %741 = vmatpush3.msra.mxu0 %v97_v1  ;;  %v90_v15 = vld [vmem:[#allocation5 + $0x40] sm:$0xff]  ;;  %v89_v18 = vld [vmem:[#allocation5 + $0x38] sm:$0xff]  ;;  %v88_v21 = vld [vmem:[#allocation5 + $0x30] sm:$0xff]  ;;  %s993_s28 = scalar_lea.vmem %s646_s2, 128  ;;  %p998_p2 = scmp.lt.s32.totalorder %s646_s2, %s646_s2 }
  0x29   :  { %742 = vmatprep.subr.mxu0 %v1024_v0  ;;  %v57_v10 = vadd.f32 %v56_v7, %v1064_v5  ;;  %v63_v11 = vrot.slane %v62_v8, 4  ;;  %v87_v24 = vld [vmem:[#allocation5 + $0x28] sm:$0xff]  ;;  %v86_v27 = vld [vmem:[#allocation5 + $0x20] sm:$0xff]  ;;  %v85_v30 = vld [vmem:[#allocation5 + $0x18] sm:$0xff]  ;;  %v1087_v39 = vsub.s32 0, %v1084_v37  ;;  %p994_p1 = scmp.ne.s32.totalorder %s646_s2, %s993_s28  ;;  %p999_p3 = scmp.lt.s32.totalorder %s993_s28, %s993_s28 }
  0x2a   :  { %743 = vmatpush3.msra.mxu0 %v96_v2  ;;  %v84_v32 = vld [vmem:[#allocation5 + $0x10] sm:$0xff]  ;;  %v83_v34 = vld [vmem:[#allocation5 + $0x8] sm:$0xff]  ;;  %v82_v35 = vld [vmem:[#allocation5] sm:$0xff] }
  0x2b   :  { %744 = vmatprep.subr.mxu0 %v1024_v0  ;;  %v58_v13 = vrot.slane %v57_v10, 2  ;;  %v64_v14 = vadd.f32 %v63_v11, %v62_v8  ;;  %v55_v38 = vld [vmem:[#allocation7] sm:$0xff]  ;;  %v212_v45 = vld [vmem:[#allocation5 + $0xf8] sm:$0xff]  ;;  %v211_v46 = vld [vmem:[#allocation5 + $0xf0] sm:$0xff]  ;;  %p1000_p4 = por %p999_p3, %p998_p2 }
  0x2c   :  { %745 = vmatpush3.msra.mxu0 %v95_v3  ;;  %776 = vmatpush3.msra.mxu1 %v212_v45  ;;  %v210_v47 = vld [vmem:[#allocation5 + $0xe8] sm:$0xff]  ;;  %v209_v48 = vld [vmem:[#allocation5 + $0xe0] sm:$0xff]  ;;  %v208_v49 = vld [vmem:[#allocation5 + $0xd8] sm:$0xff] }
  0x2d   :  { %746 = vmatprep.subr.mxu0 %v1024_v0  ;;  %v59_v16 = vadd.f32 %v58_v13, %v57_v10  ;;  %v65_v17 = vrot.slane %v64_v14, 2  ;;  %777 = vmatprep.subr.mxu1 %v1024_v0  ;;  %v207_v50 = vld [vmem:[#allocation5 + $0xd0] sm:$0xff]  ;;  %v206_v51 = vld [vmem:[#allocation5 + $0xc8] sm:$0xff]  ;;  %v205_v52 = vld [vmem:[#allocation5 + $0xc0] sm:$0xff]  ;;  %p1001_p5 = pnand %p1000_p4, %p994_p1 }
  0x2e   :  { %747 = vmatpush3.msra.mxu0 %v94_v4  ;;  %778 = vmatpush3.msra.mxu1 %v211_v46  ;;  %v204_v53 = vld [vmem:[#allocation5 + $0xb8] sm:$0xff]  ;;  %v203_v54 = vld [vmem:[#allocation5 + $0xb0] sm:$0xff]  ;;  %v202_v55 = vld [vmem:[#allocation5 + $0xa8] sm:$0xff] }
  0x2f   :  { %748 = vmatprep.subr.mxu0 %v1024_v0  ;;  %v60_v19 = vrot.slane %v59_v16, 1  ;;  %v66_v20 = vadd.f32 %v65_v17, %v64_v14  ;;  %779 = vmatprep.subr.mxu1 %v1024_v0  ;;  %v201_v56 = vld [vmem:[#allocation5 + $0xa0] sm:$0xff]  ;;  %v200_v57 = vld [vmem:[#allocation5 + $0x98] sm:$0xff]  ;;  %v199_v58 = vld [vmem:[#allocation5 + $0x90] sm:$0xff] }
  0x30   :  { %749 = vmatpush3.msra.mxu0 %v93_v6  ;;  %780 = vmatpush3.msra.mxu1 %v210_v47  ;;  %v198_v59 = vld [vmem:[#allocation5 + $0x88] sm:$0xff]  ;;  %v197_v60 = vld [vmem:[#allocation5 + $0x80] sm:$0xff]  ;;  %v315_v36 = vld [vmem:[#allocation5 + $0x118] sm:$0xff] }
  0x31   :  { %750 = vmatprep.subr.mxu0 %v1024_v0  ;;  %v61_v22 = vadd.f32 %v60_v19, %v59_v16  ;;  %v67_v23 = vrot.slane %v66_v20, 1  ;;  %781 = vmatprep.subr.mxu1 %v1024_v0 }
  0x32   :  { %751 = vmatpush3.msra.mxu0 %v92_v9  ;;  %782 = vmatpush3.msra.mxu1 %v209_v48 }
  0x33   :  { %752 = vmatprep.subr.mxu0 %v1024_v0  ;;  %v68_v25 = vadd.f32 %v67_v23, %v66_v20  ;;  %v69_v26 = vmul.f32 0.125, %v61_v22  ;;  %783 = vmatprep.subr.mxu1 %v1024_v0 }
  0x34   :  { %753 = vmatpush3.msra.mxu0 %v91_v12  ;;  %784 = vmatpush3.msra.mxu1 %v208_v49 }
  0x35   :  { %754 = vmatprep.subr.mxu0 %v1024_v0  ;;  %v70_v28 = vmul.f32 0.125, %v68_v25  ;;  %v71_v29 = vmul.f32 %v69_v26, %v69_v26  ;;  %v76_v42 = vsub.f32 %v1064_v5, %v69_v26  ;;  %785 = vmatprep.subr.mxu1 %v1024_v0  ;;  %v326_v25 = vld [vmem:[#allocation5 + $0x170] sm:$0xff]  ;;  %v325_v26 = vld [vmem:[#allocation5 + $0x168] sm:$0xff] }
  0x36   :  { %755 = vmatpush3.msra.mxu0 %v90_v15  ;;  %786 = vmatpush3.msra.mxu1 %v207_v50 }
  0x37   :  { %756 = vmatprep.subr.mxu0 %v1024_v0  ;;  %v72_v31 = vsub.f32 %v70_v28, %v71_v29  ;;  %787 = vmatprep.subr.mxu1 %v1024_v0  ;;  %v323_v28 = vld [vmem:[#allocation5 + $0x158] sm:$0xff]  ;;  %v322_v29 = vld [vmem:[#allocation5 + $0x150] sm:$0xff] }
  0x38   :  { %757 = vmatpush3.msra.mxu0 %v89_v18  ;;  %788 = vmatpush3.msra.mxu1 %v206_v51  ;;  %v169_v18 = vld [vmem:[#allocation7 + $0x8] sm:$0xff] }
  0x39   :  { %758 = vmatprep.subr.mxu0 %v1024_v0  ;;  %v73_v33 = vadd.f32 1e-05, %v72_v31  ;;  %789 = vmatprep.subr.mxu1 %v1024_v0  ;;  %v320_v31 = vld [vmem:[#allocation5 + $0x140] sm:$0xff] }
  0x3a   :  { %759 = vmatpush3.msra.mxu0 %v88_v21  ;;  %790 = vmatpush3.msra.mxu1 %v205_v52 }
  0x3b   :  { %760 = vmatprep.subr.mxu0 %v1024_v0  ;;  %923 = vrsqrt.f32 %v73_v33  ;;  %791 = vmatprep.subr.mxu1 %v1024_v0  ;;  %v318_v33 = vld [vmem:[#allocation5 + $0x130] sm:$0xff] }
  0x3c   :  { %761 = vmatpush3.msra.mxu0 %v87_v24  ;;  %792 = vmatpush3.msra.mxu1 %v204_v53  ;;  %v327_v24 = vld [vmem:[#allocation5 + $0x178] sm:$0xff] }
  0x3d   :  { %762 = vmatprep.subr.mxu0 %v1024_v0  ;;  %793 = vmatprep.subr.mxu1 %v1024_v0 }
  0x3e   :  { %763 = vmatpush3.msra.mxu0 %v86_v27  ;;  %794 = vmatpush3.msra.mxu1 %v203_v54  ;;  %v324_v27 = vld [vmem:[#allocation5 + $0x160] sm:$0xff] }
  0x3f   :  { %764 = vmatprep.subr.mxu0 %v1024_v0  ;;  %795 = vmatprep.subr.mxu1 %v1024_v0 }
  0x40   :  { %765 = vmatpush3.msra.mxu0 %v85_v30  ;;  %796 = vmatpush3.msra.mxu1 %v202_v55  ;;  %v321_v30 = vld [vmem:[#allocation5 + $0x148] sm:$0xff] }
  0x41   :  { %766 = vmatprep.subr.mxu0 %v1024_v0  ;;  %797 = vmatprep.subr.mxu1 %v1024_v0 }
  0x42   :  { %767 = vmatpush3.msra.mxu0 %v84_v32  ;;  %798 = vmatpush3.msra.mxu1 %v201_v56  ;;  %v319_v32 = vld [vmem:[#allocation5 + $0x138] sm:$0xff] }
  0x43   :  { %768 = vmatprep.subr.mxu0 %v1024_v0  ;;  %799 = vmatprep.subr.mxu1 %v1024_v0 }
  0x44   :  { %769 = vmatpush3.msra.mxu0 %v83_v34  ;;  %800 = vmatpush3.msra.mxu1 %v200_v57  ;;  %v317_v34 = vld [vmem:[#allocation5 + $0x128] sm:$0xff] }
  0x45   :  { %770 = vmatprep.subr.mxu0 %v1024_v0  ;;  %801 = vmatprep.subr.mxu1 %v1024_v0 }
  0x46   :  { %771 = vmatpush3.msra.mxu0 %v82_v35  ;;  %802 = vmatpush3.msra.mxu1 %v199_v58  ;;  %v316_v35 = vld [vmem:[#allocation5 + $0x120] sm:$0xff] }
  0x47   :  { %810 = vmatprep.subr.mxu0 %v1024_v0  ;;  %803 = vmatprep.subr.mxu1 %v1024_v0 }
  0x48   :  { %v924_v40 = vpop.eup %923  ;;  %804 = vmatpush3.msra.mxu1 %v198_v59 }
  0x49   :  { %v75_v41 = vmul.f32 %v924_v40, %v55_v38  ;;  %805 = vmatprep.subr.mxu1 %v1024_v0  ;;  %v314_v38 = vld [vmem:[#allocation5 + $0x110] sm:$0xff]  ;;  %v313_v40 = vld [vmem:[#allocation5 + $0x108] sm:$0xff] }
  0x4a   :  { %806 = vmatpush3.msra.mxu1 %v197_v60 }
  0x4b   :  { %v80_v43 = vrot.slane %v75_v41, %v1087_v39  ;;  %845 = vmatprep.subr.mxu1 %v1024_v0  ;;  %v312_v41 = vld [vmem:[#allocation5 + $0x100] sm:$0xff] }
  0x4d   :  { %v81_v44 = vmul.f32 %v80_v43, %v76_v42 }
  0x4f   :  { %773 = vmatmul.mubr.f32.vlgmr.msra.gmra.mxu0 %v81_v44 }
  0x50   :  { %842 = vmatprep.mubr.msk.f32.mxu0 %vm1025_vm0, %v1024_v0  ;;  %811 = vmatpush3.msra.mxu0 %v327_v24 }
  0x51   :  { %812 = vmatprep.subr.mxu0 %v1024_v0 }
  0x52   :  { %813 = vmatpush3.msra.mxu0 %v326_v25 }
  0x53   :  { %814 = vmatprep.subr.mxu0 %v1024_v0 }
  0x54   :  { %815 = vmatpush3.msra.mxu0 %v325_v26 }
  0x55   :  { %816 = vmatprep.subr.mxu0 %v1024_v0 }
  0x56   :  { %817 = vmatpush3.msra.mxu0 %v324_v27 }
  0x57   :  { %818 = vmatprep.subr.mxu0 %v1024_v0 }
  0x58   :  { %819 = vmatpush3.msra.mxu0 %v323_v28 }
  0x59   :  { %820 = vmatprep.subr.mxu0 %v1024_v0 }
  0x5a   :  { %821 = vmatpush3.msra.mxu0 %v322_v29 }
  0x5b   :  { %822 = vmatprep.subr.mxu0 %v1024_v0 }
  0x5c   :  { %823 = vmatpush3.msra.mxu0 %v321_v30 }
  0x5d   :  { %824 = vmatprep.subr.mxu0 %v1024_v0 }
  0x5e   :  { %825 = vmatpush3.msra.mxu0 %v320_v31 }
  0x5f   :  { %826 = vmatprep.subr.mxu0 %v1024_v0 }
  0x60   :  { %827 = vmatpush3.msra.mxu0 %v319_v32 }
  0x61   :  { %828 = vmatprep.subr.mxu0 %v1024_v0 }
  0x62   :  { %829 = vmatpush3.msra.mxu0 %v318_v33 }
  0x63   :  { %830 = vmatprep.subr.mxu0 %v1024_v0 }
  0x64   :  { %831 = vmatpush3.msra.mxu0 %v317_v34 }
  0x65   :  { %832 = vmatprep.subr.mxu0 %v1024_v0 }
  0x66   :  { %833 = vmatpush3.msra.mxu0 %v316_v35 }
  0x67   :  { %834 = vmatprep.subr.mxu0 %v1024_v0 }
  0x68   :  { %835 = vmatpush3.msra.mxu0 %v315_v36 }
  0x69   :  { %836 = vmatprep.subr.mxu0 %v1024_v0 }
  0x6a   :  { %837 = vmatpush3.msra.mxu0 %v314_v38 }
  0x6b   :  { %838 = vmatprep.subr.mxu0 %v1024_v0 }
  0x6c   :  { %839 = vmatpush3.msra.mxu0 %v313_v40 }
  0x6d   :  { %840 = vmatprep.subr.mxu0 %v1024_v0 }
  0x6e   :  { %841 = vmatpush3.msra.mxu0 %v312_v41 }
  0x6f   :  { %880 = vmatprep.subr.mxu0 %v1024_v0 }
 0x10f   :  { %v164_v61 = vpop.f32.mrf.mxu0 }
 0x110   :  { %v170_v62 = vrot.slane %v164_v61, 4  ;;  %v176_v63 = vmul.f32 %v164_v61, %v164_v61 }
 0x111   :  { %v774_v1 = vpop.f32.mrf.mxu0 }
 0x112   :  { %v171_v2 = vadd.f32 %v170_v62, %v164_v61  ;;  %v177_v3 = vrot.slane %v176_v63, 4  ;;  %v284_v62 = vld [vmem:[#allocation7 + $0x10] sm:$0xff] }
 0x114   :  { %v172_v4 = vrot.slane %v171_v2, 2  ;;  %v178_v5 = vadd.f32 %v177_v3, %v176_v63 }
 0x116   :  { %v173_v6 = vadd.f32 %v172_v4, %v171_v2  ;;  %v179_v7 = vrot.slane %v178_v5, 2 }
 0x118   :  { %v174_v8 = vrot.slane %v173_v6, 1  ;;  %v180_v9 = vadd.f32 %v179_v7, %v178_v5  ;;  %v442_v5 = vld [vmem:[#allocation5 + $0x1f8] sm:$0xff]  ;;  %v440_v7 = vld [vmem:[#allocation5 + $0x1e8] sm:$0xff] }
 0x11a   :  { %v175_v10 = vadd.f32 %v174_v8, %v173_v6  ;;  %v181_v11 = vrot.slane %v180_v9, 1  ;;  %v441_v6 = vld [vmem:[#allocation5 + $0x1f0] sm:$0xff]  ;;  %v439_v8 = vld [vmem:[#allocation5 + $0x1e0] sm:$0xff] }
 0x11c   :  { %v182_v12 = vadd.f32 %v181_v11, %v180_v9  ;;  %v183_v13 = vmul.f32 0.125, %v175_v10  ;;  %v438_v9 = vld [vmem:[#allocation5 + $0x1d8] sm:$0xff]  ;;  %v437_v10 = vld [vmem:[#allocation5 + $0x1d0] sm:$0xff]  ;;  %v436_v11 = vld [vmem:[#allocation5 + $0x1c8] sm:$0xff] }
 0x11e   :  { %v184_v14 = vmul.f32 0.125, %v182_v12  ;;  %v185_v15 = vmul.f32 %v183_v13, %v183_v13  ;;  %v190_v21 = vsub.f32 %v164_v61, %v183_v13  ;;  %v435_v12 = vld [vmem:[#allocation5 + $0x1c0] sm:$0xff]  ;;  %v434_v13 = vld [vmem:[#allocation5 + $0x1b8] sm:$0xff] }
 0x120   :  { %v186_v16 = vsub.f32 %v184_v14, %v185_v15  ;;  %v433_v14 = vld [vmem:[#allocation5 + $0x1b0] sm:$0xff]  ;;  %v432_v15 = vld [vmem:[#allocation5 + $0x1a8] sm:$0xff] }
 0x122   :  { %v187_v17 = vadd.f32 1e-05, %v186_v16  ;;  %v431_v16 = vld [vmem:[#allocation5 + $0x1a0] sm:$0xff] }
 0x124   :  { %925 = vrsqrt.f32 %v187_v17  ;;  %v430_v17 = vld [vmem:[#allocation5 + $0x198] sm:$0xff] }
 0x131   :  { %v926_v19 = vpop.eup %925 }
 0x132   :  { %v189_v20 = vmul.f32 %v926_v19, %v169_v18  ;;  %v429_v18 = vld [vmem:[#allocation5 + $0x190] sm:$0xff]  ;;  %v428_v19 = vld [vmem:[#allocation5 + $0x188] sm:$0xff] }
 0x134   :  { %v194_v22 = vrot.slane %v189_v20, %v1087_v39  ;;  %v427_v20 = vld [vmem:[#allocation5 + $0x180] sm:$0xff] }
 0x136   :  { %v195_v23 = vmul.f32 %v194_v22, %v190_v21 }
 0x138   :  { %808 = vmatmul.mubr.f32.vlgmr.msra.gmra.mxu1 %v195_v23 }
 0x139   :  { %877 = vmatprep.mubr.msk.f32.mxu1 %vm1025_vm0, %v1024_v0  ;;  %846 = vmatpush3.msra.mxu1 %v442_v5 }
 0x13a   :  { %847 = vmatprep.subr.mxu1 %v1024_v0 }
 0x13b   :  { %848 = vmatpush3.msra.mxu1 %v441_v6 }
 0x13c   :  { %849 = vmatprep.subr.mxu1 %v1024_v0 }
 0x13d   :  { %850 = vmatpush3.msra.mxu1 %v440_v7 }
 0x13e   :  { %851 = vmatprep.subr.mxu1 %v1024_v0 }
 0x13f   :  { %852 = vmatpush3.msra.mxu1 %v439_v8 }
 0x140   :  { %853 = vmatprep.subr.mxu1 %v1024_v0 }
 0x141   :  { %854 = vmatpush3.msra.mxu1 %v438_v9 }
 0x142   :  { %855 = vmatprep.subr.mxu1 %v1024_v0 }
 0x143   :  { %856 = vmatpush3.msra.mxu1 %v437_v10 }
 0x144   :  { %857 = vmatprep.subr.mxu1 %v1024_v0 }
 0x145   :  { %858 = vmatpush3.msra.mxu1 %v436_v11 }
 0x146   :  { %859 = vmatprep.subr.mxu1 %v1024_v0 }
 0x147   :  { %860 = vmatpush3.msra.mxu1 %v435_v12 }
 0x148   :  { %861 = vmatprep.subr.mxu1 %v1024_v0 }
 0x149   :  { %862 = vmatpush3.msra.mxu1 %v434_v13 }
 0x14a   :  { %863 = vmatprep.subr.mxu1 %v1024_v0 }
 0x14b   :  { %864 = vmatpush3.msra.mxu1 %v433_v14 }
 0x14c   :  { %865 = vmatprep.subr.mxu1 %v1024_v0 }
 0x14d   :  { %866 = vmatpush3.msra.mxu1 %v432_v15 }
 0x14e   :  { %867 = vmatprep.subr.mxu1 %v1024_v0 }
 0x14f   :  { %868 = vmatpush3.msra.mxu1 %v431_v16 }
 0x150   :  { %869 = vmatprep.subr.mxu1 %v1024_v0 }
 0x151   :  { %870 = vmatpush3.msra.mxu1 %v430_v17 }
 0x152   :  { %871 = vmatprep.subr.mxu1 %v1024_v0 }
 0x153   :  { %872 = vmatpush3.msra.mxu1 %v429_v18 }
 0x154   :  { %873 = vmatprep.subr.mxu1 %v1024_v0 }
 0x155   :  { %874 = vmatpush3.msra.mxu1 %v428_v19 }
 0x156   :  { %875 = vmatprep.subr.mxu1 %v1024_v0 }
 0x157   :  { %876 = vmatpush3.msra.mxu1 %v427_v20 }
 0x1f8   :  { %v279_v42 = vpop.f32.mrf.mxu1 }
 0x1f9   :  { %v285_v43 = vrot.slane %v279_v42, 4  ;;  %v291_v44 = vmul.f32 %v279_v42, %v279_v42 }
 0x1fa   :  { %v809_v45 = vpop.f32.mrf.mxu1 }
 0x1fb   :  { %v286_v46 = vadd.f32 %v285_v43, %v279_v42  ;;  %v292_v47 = vrot.slane %v291_v44, 4  ;;  %v399_v43 = vld [vmem:[#allocation7 + $0x18] sm:$0xff] }
 0x1fd   :  { %v287_v48 = vrot.slane %v286_v46, 2  ;;  %v293_v49 = vadd.f32 %v292_v47, %v291_v44 }
 0x1ff   :  { %v288_v50 = vadd.f32 %v287_v48, %v286_v46  ;;  %v294_v51 = vrot.slane %v293_v49, 2 }
 0x201   :  { %v289_v52 = vrot.slane %v288_v50, 1  ;;  %v295_v53 = vadd.f32 %v294_v51, %v293_v49  ;;  %v562_v49 = vld [vmem:[#allocation5 + $0x278] sm:$0xff]  ;;  %v560_v51 = vld [vmem:[#allocation5 + $0x268] sm:$0xff] }
 0x203   :  { %v290_v54 = vadd.f32 %v289_v52, %v288_v50  ;;  %v296_v55 = vrot.slane %v295_v53, 1  ;;  %v561_v50 = vld [vmem:[#allocation5 + $0x270] sm:$0xff]  ;;  %v559_v52 = vld [vmem:[#allocation5 + $0x260] sm:$0xff] }
 0x205   :  { %v297_v56 = vadd.f32 %v296_v55, %v295_v53  ;;  %v298_v57 = vmul.f32 0.125, %v290_v54  ;;  %v558_v53 = vld [vmem:[#allocation5 + $0x258] sm:$0xff]  ;;  %v557_v54 = vld [vmem:[#allocation5 + $0x250] sm:$0xff]  ;;  %v556_v55 = vld [vmem:[#allocation5 + $0x248] sm:$0xff] }
 0x207   :  { %v299_v58 = vmul.f32 0.125, %v297_v56  ;;  %v300_v59 = vmul.f32 %v298_v57, %v298_v57  ;;  %v305_v2 = vsub.f32 %v279_v42, %v298_v57  ;;  %v555_v56 = vld [vmem:[#allocation5 + $0x240] sm:$0xff]  ;;  %v554_v57 = vld [vmem:[#allocation5 + $0x238] sm:$0xff] }
 0x209   :  { %v301_v60 = vsub.f32 %v299_v58, %v300_v59  ;;  %v553_v58 = vld [vmem:[#allocation5 + $0x230] sm:$0xff]  ;;  %v552_v59 = vld [vmem:[#allocation5 + $0x228] sm:$0xff] }
 0x20b   :  { %v302_v61 = vadd.f32 1e-05, %v301_v60  ;;  %v551_v60 = vld [vmem:[#allocation5 + $0x220] sm:$0xff] }
 0x20d   :  { %927 = vrsqrt.f32 %v302_v61  ;;  %v550_v61 = vld [vmem:[#allocation5 + $0x218] sm:$0xff] }
 0x21a   :  { %v928_v63 = vpop.eup %927 }
 0x21b   :  { %v304_v1 = vmul.f32 %v928_v63, %v284_v62  ;;  %v549_v62 = vld [vmem:[#allocation5 + $0x210] sm:$0xff]  ;;  %v548_v63 = vld [vmem:[#allocation5 + $0x208] sm:$0xff] }
 0x21d   :  { %v309_v3 = vrot.slane %v304_v1, %v1087_v39  ;;  %v547_v1 = vld [vmem:[#allocation5 + $0x200] sm:$0xff] }
 0x21f   :  { %v310_v4 = vmul.f32 %v309_v3, %v305_v2 }
 0x221   :  { %843 = vmatmul.mubr.f32.vlgmr.msra.gmra.mxu0 %v310_v4 }
 0x222   :  { %912 = vmatprep.mubr.msk.f32.mxu0 %vm1025_vm0, %v1024_v0  ;;  %881 = vmatpush3.msra.mxu0 %v562_v49 }
 0x223   :  { %882 = vmatprep.subr.mxu0 %v1024_v0 }
 0x224   :  { %883 = vmatpush3.msra.mxu0 %v561_v50 }
 0x225   :  { %884 = vmatprep.subr.mxu0 %v1024_v0 }
 0x226   :  { %885 = vmatpush3.msra.mxu0 %v560_v51 }
 0x227   :  { %886 = vmatprep.subr.mxu0 %v1024_v0 }
 0x228   :  { %887 = vmatpush3.msra.mxu0 %v559_v52 }
 0x229   :  { %888 = vmatprep.subr.mxu0 %v1024_v0 }
 0x22a   :  { %889 = vmatpush3.msra.mxu0 %v558_v53 }
 0x22b   :  { %890 = vmatprep.subr.mxu0 %v1024_v0 }
 0x22c   :  { %891 = vmatpush3.msra.mxu0 %v557_v54 }
 0x22d   :  { %892 = vmatprep.subr.mxu0 %v1024_v0 }
 0x22e   :  { %893 = vmatpush3.msra.mxu0 %v556_v55 }
 0x22f   :  { %894 = vmatprep.subr.mxu0 %v1024_v0 }
 0x230   :  { %895 = vmatpush3.msra.mxu0 %v555_v56 }
 0x231   :  { %896 = vmatprep.subr.mxu0 %v1024_v0 }
 0x232   :  { %897 = vmatpush3.msra.mxu0 %v554_v57 }
 0x233   :  { %898 = vmatprep.subr.mxu0 %v1024_v0 }
 0x234   :  { %899 = vmatpush3.msra.mxu0 %v553_v58 }
 0x235   :  { %900 = vmatprep.subr.mxu0 %v1024_v0 }
 0x236   :  { %901 = vmatpush3.msra.mxu0 %v552_v59 }
 0x237   :  { %902 = vmatprep.subr.mxu0 %v1024_v0 }
 0x238   :  { %903 = vmatpush3.msra.mxu0 %v551_v60 }
 0x239   :  { %904 = vmatprep.subr.mxu0 %v1024_v0 }
 0x23a   :  { %905 = vmatpush3.msra.mxu0 %v550_v61 }
 0x23b   :  { %906 = vmatprep.subr.mxu0 %v1024_v0 }
 0x23c   :  { %907 = vmatpush3.msra.mxu0 %v549_v62 }
 0x23d   :  { %908 = vmatprep.subr.mxu0 %v1024_v0 }
 0x23e   :  { %909 = vmatpush3.msra.mxu0 %v548_v63 }
 0x23f   :  { %910 = vmatprep.subr.mxu0 %v1024_v0 }
 0x240   :  { %911 = vmatpush3.msra.mxu0 %v547_v1 }
 0x2e1   :  { %v394_v21 = vpop.f32.mrf.mxu0 }
 0x2e2   :  { %v400_v22 = vrot.slane %v394_v21, 4  ;;  %v406_v23 = vmul.f32 %v394_v21, %v394_v21 }
 0x2e3   :  { %v844_v24 = vpop.f32.mrf.mxu0 }
 0x2e4   :  { %v401_v25 = vadd.f32 %v400_v22, %v394_v21  ;;  %v407_v26 = vrot.slane %v406_v23, 4  ;;  %v543_v22 = vsub.s32 1, %v1084_v37 }
 0x2e6   :  { %v402_v27 = vrot.slane %v401_v25, 2  ;;  %v408_v28 = vadd.f32 %v407_v26, %v406_v23 }
 0x2e8   :  { %v403_v29 = vadd.f32 %v402_v27, %v401_v25  ;;  %v409_v30 = vrot.slane %v408_v28, 2 }
 0x2ea   :  { %v404_v31 = vrot.slane %v403_v29, 1  ;;  %v410_v32 = vadd.f32 %v409_v30, %v408_v28  ;;  %v565_v30 = vsub.s32 2, %v1084_v37 }
 0x2ec   :  { %v405_v33 = vadd.f32 %v404_v31, %v403_v29  ;;  %v411_v34 = vrot.slane %v410_v32, 1 }
 0x2ee   :  { %v412_v35 = vadd.f32 %v411_v34, %v410_v32  ;;  %v413_v36 = vmul.f32 0.125, %v405_v33 }
 0x2f0   :  { %v414_v38 = vmul.f32 0.125, %v412_v35  ;;  %v415_v40 = vmul.f32 %v413_v36, %v413_v36  ;;  %v420_v46 = vsub.f32 %v394_v21, %v413_v36  ;;  %v514_v21 = vld [vmem:[#allocation7 + $0x20] sm:$0xff] }
 0x2f1   :  { %v544_v27 = vrot.slane %v514_v21, %v543_v22  ;;  %v566_v31 = vrot.slane %v514_v21, %v565_v30 }
 0x2f2   :  { %v416_v41 = vsub.f32 %v414_v38, %v415_v40 }
 0x2f4   :  { %v417_v42 = vadd.f32 1e-05, %v416_v41 }
 0x2f6   :  { %929 = vrsqrt.f32 %v417_v42 }
 0x303   :  { %v930_v44 = vpop.eup %929 }
 0x304   :  { %v419_v45 = vmul.f32 %v930_v44, %v399_v43 }
 0x306   :  { %v424_v47 = vrot.slane %v419_v45, %v1087_v39 }
 0x308   :  { %v425_v48 = vmul.f32 %v424_v47, %v420_v46 }
 0x30a   :  { %878 = vmatmul.mubr.f32.vlgmr.msra.gmra.mxu1 %v425_v48 }
 0x3ca   :  { %v509_v2 = vpop.f32.mrf.mxu1 }
 0x3cb   :  { %v515_v3 = vrot.slane %v509_v2, 4  ;;  %v521_v4 = vmul.f32 %v509_v2, %v509_v2 }
 0x3cc   :  { %v879_v5 = vpop.f32.mrf.mxu1 }
 0x3cd   :  { %v516_v6 = vadd.f32 %v515_v3, %v509_v2  ;;  %v522_v7 = vrot.slane %v521_v4, 4 }
 0x3cf   :  { %v517_v8 = vrot.slane %v516_v6, 2  ;;  %v523_v9 = vadd.f32 %v522_v7, %v521_v4 }
 0x3d1   :  { %v518_v10 = vadd.f32 %v517_v8, %v516_v6  ;;  %v524_v11 = vrot.slane %v523_v9, 2 }
 0x3d3   :  { %v519_v12 = vrot.slane %v518_v10, 1  ;;  %v525_v13 = vadd.f32 %v524_v11, %v523_v9 }
 0x3d5   :  { %v520_v14 = vadd.f32 %v519_v12, %v518_v10  ;;  %v526_v15 = vrot.slane %v525_v13, 1 }
 0x3d7   :  { %v527_v16 = vadd.f32 %v526_v15, %v525_v13  ;;  %v528_v17 = vmul.f32 0.125, %v520_v14 }
 0x3d9   :  { %v529_v18 = vmul.f32 0.125, %v527_v16  ;;  %v530_v19 = vmul.f32 %v528_v17, %v528_v17  ;;  %v535_v25 = vsub.f32 %v509_v2, %v528_v17 }
 0x3db   :  { %v531_v0 = vsub.f32 %v529_v18, %v530_v19 }
 0x3dd   :  { %v532_v20 = vadd.f32 1e-05, %v531_v0 }
 0x3df   :  { %931 = vrsqrt.f32 %v532_v20 }
 0x3ec   :  { %v932_v23 = vpop.eup %931 }
 0x3ed   :  { %v534_v24 = vmul.f32 %v932_v23, %v514_v21 }
 0x3ef   :  { %v539_v26 = vrot.slane %v534_v24, %v1087_v39 }
 0x3f1   :  { %v540_v28 = vmul.f32 %v539_v26, %v535_v25 }
 0x3f3   :  { %v545_v29 = vadd.f32 %v544_v27, %v540_v28 }
 0x3f5   :  { %913 = vmatmul.mubr.f32.vlgmr.msra.gmra.mxu0 %v545_v29 }
 0x4b5   :  { %v633_v32 = vpop.f32.mrf.mxu0 }
 0x4b6   :  { %v634_v33 = vadd.f32 %v633_v32, %v566_v31 }
 0x4b7   :  { %v914_v34 = vpop.f32.mrf.mxu0 }
 0x4b8   :  { %638 = vst.msk [vmem:[#allocation8] sm:$0xff] %vm637_vm1, %v634_v33 }
 0x4b9   :  { %1004 = shalt.err (!%p1001_p5)
}
 0x4ba   :  { %648 = dma.vmem_to_hbm [thread:$0]  %s646_s2, 128, %s1171_s3, [#allocation4]  }
 0x4bb   :  { %1017 = dma.done.wait [#allocation4], 128  }
 0x4bc   :  { %1018 = vsyncadd [#allocation4], 4294967168 }
 0x4bd   :  { %652 = vsyncpa [#allocation3], 1 }
 0x4be   :  { %653 = vsyncpa [#allocation6], 1 }
 0x4bf   :  { %654 = vsyncpa [#allocation4], 1 }

</bundles_post_ra>
